<compile_context>
chip_gen: v7x
topology: tpu7x:2x2x1
jax: 0.10.0
libtpu: 0.0.40
codegen_flags: <defaults>
</compile_context>

<pallas_src>
from contextlib import contextmanager

import jax
import jax.numpy as jnp
from jax.experimental import pallas as pl
from jax.experimental.pallas import tpu as pltpu

MAX_TOKEN_TILE = 1024  # >=512-row tiles hit ~85% of HBM roofline; keeps VMEM tiny.


# ---------------------------------------------------------------------------
# Pallas kernel: batched dense layer, bf16 MXU inputs, f32 accumulation
# ---------------------------------------------------------------------------
def _linear_kernel(x_ref, w_ref, b_ref, o_ref):
    # x streams per grid step; cast to bf16 on the VPU (no-op if already bf16).
    # W arrives pre-cast to bf16 and is VMEM-resident (constant block index),
    # so no per-step cast or re-DMA happens for it.
    acc = jnp.dot(
        x_ref[...].astype(jnp.bfloat16),
        w_ref[...],
        preferred_element_type=jnp.float32,  # f32 MXU accumulation
    )
    o_ref[...] = (acc + b_ref[...]).astype(o_ref.dtype)


def _choose_token_tile(tokens: int) -> int:
    """>=2 grid steps when possible (so v7x's two TCs both get work), rows a
    multiple of 8 (sublane), capped at MAX_TOKEN_TILE."""
    half = -(-tokens // 2)      # ceil(tokens / 2)
    tile = -(-half // 8) * 8    # round up to sublane multiple
    return max(8, min(MAX_TOKEN_TILE, tile))


@jax.jit
def linear_forward(x, w_bf16, b):
    """y = x @ W + b  (bf16 MXU inputs, f32 accumulation, bf16 output).

    x: [tokens, hidden_in] (any float dtype; cast to bf16 inside the kernel)
    w_bf16: [hidden_in, hidden_out] bf16 (pre-cast once by the module)
    b: [hidden_out] f32

    No feature-axis padding: 32-wide blocks are legal because they equal the
    full array dims, and skipping the pad/slice passes removes the dominant
    HBM traffic for this tiny (hidden=32) layer.
    """
    tokens, hidden_in = x.shape
    hidden_out = w_bf16.shape[1]

    tile = _choose_token_tile(tokens)
    pad = (-tokens) % tile
    xp = jnp.pad(x, ((0, pad), (0, 0))) if pad else x
    tok_p = tokens + pad
    grid = (tok_p // tile,)

    b2 = b.reshape(1, hidden_out).astype(jnp.float32)

    cost = pl.CostEstimate(
        flops=2 * tok_p * hidden_in * hidden_out,
        transcendentals=0,
        bytes_accessed=(
            tok_p * hidden_in * xp.dtype.itemsize   # read x
            + hidden_in * hidden_out * 2            # read W (bf16, once)
            + hidden_out * 4                        # read b (f32, once)
            + tok_p * hidden_out * 2                # write y (bf16)
        ),
    )

    out = pl.pallas_call(
        _linear_kernel,
        out_shape=jax.ShapeDtypeStruct((tok_p, hidden_out), jnp.bfloat16),
        grid=grid,
        in_specs=[
            # Activations stream over the token grid axis, unpadded 32-wide.
            pl.BlockSpec((tile, hidden_in), lambda i: (i, 0)),
            # W / b: constant block index -> VMEM-resident, no per-step re-DMA.
            pl.BlockSpec((hidden_in, hidden_out), lambda i: (0, 0)),
            pl.BlockSpec((1, hidden_out), lambda i: (0, 0)),
        ],
        out_specs=pl.BlockSpec((tile, hidden_out), lambda i: (i, 0)),
        compiler_params=pltpu.CompilerParams(
            # Token axis is embarrassingly parallel: v7x's 2 TCs split it.
            dimension_semantics=("parallel",),
        ),
        cost_estimate=cost,
    )(xp, w_bf16, b2)

    return out[:tokens] if pad else out


# ---------------------------------------------------------------------------
# Inner module (deterministic params) + the DDP wrapper being translated
# ---------------------------------------------------------------------------
class TinyLinearModule:
    """Stand-in for the wrapped model; forward runs the Pallas kernel."""

    def __init__(self, hidden: int, key):
        k_w, k_b = jax.random.split(key)
        w_f32 = jax.random.normal(k_w, (hidden, hidden), dtype=jnp.float32) * 0.02
        # Pre-cast once: the MXU path is bf16 anyway, and this removes a
        # redundant per-grid-step VPU cast of the VMEM-resident operand.
        self.w = w_f32.astype(jnp.bfloat16)
        self.b = jax.random.normal(k_b, (hidden,), dtype=jnp.float32) * 0.02

    def __call__(self, x):
        return linear_forward(x, self.w, self.b)


class DummyDDPWrapper:
    """Faithful port of the PyTorch DummyDDPWrapper: pure delegation."""

    def __init__(self, module):
        self.module = module

    def __call__(self, *args, **kwargs):
        return self.module(*args, **kwargs)

    def forward(self, *args, **kwargs):
        return self.module(*args, **kwargs)

    @contextmanager
    def join(self):
        yield


# ---------------------------------------------------------------------------
if __name__ == "__main__":
    key = jax.random.PRNGKey(0)
    k_param, k_x = jax.random.split(key)

    hidden = 32
    # Whole microbatch of tokens (e.g. 64 sequences of length 8) in ONE
    # gridded launch; tile=256 -> grid=2, so both v7x TensorCores get work.
    tokens = 512

    inner = TinyLinearModule(hidden, k_param)
    model = DummyDDPWrapper(inner)

    x = jax.random.normal(k_x, (tokens, hidden), dtype=jnp.float32)

    with model.join():
        y = model(x)
    y = jax.block_until_ready(y)

    # Reference of the delegated forward with the same bf16-MXU / f32-acc
    # numerics and bf16 output the kernel uses.
    ref = (
        jnp.dot(x.astype(jnp.bfloat16), inner.w, preferred_element_type=jnp.float32)
        + inner.b
    ).astype(jnp.bfloat16)

    assert y.shape == (tokens, hidden)
    assert y.dtype == jnp.bfloat16
    err = float(jnp.max(jnp.abs(y.astype(jnp.float32) - ref.astype(jnp.float32))))
    assert err <= 1e-2, err

    print("KERNEL_OK")
</pallas_src>

<mosaic_0001>
module attributes {stable_mosaic.version = 11 : i64} {
  func.func @_linear_kernel(%arg0: i32, %arg1: memref<256x32xf32, #tpu.memory_space<vmem>>, %arg2: memref<32x32xbf16, #tpu.memory_space<vmem>>, %arg3: memref<1x32xf32, #tpu.memory_space<vmem>>, %arg4: memref<256x32xbf16, #tpu.memory_space<vmem>>) attributes {dimension_semantics = [#tpu.dimension_semantics<parallel>], iteration_bounds = array<i64: 2>, scalar_prefetch = 0 : i64, scratch_operands = 0 : i64, tpu.core_type = #tpu.core_type<tc>, window_params = [{transform_indices = @transform_0, window_bounds = array<i64: 256, 32>}, {pipeline_mode = #tpu.pipeline_mode<synchronous>, transform_indices = @transform_1, window_bounds = array<i64: 32, 32>}, {pipeline_mode = #tpu.pipeline_mode<synchronous>, transform_indices = @transform_2, window_bounds = array<i64: 1, 32>}, {transform_indices = @transform_3, window_bounds = array<i64: 256, 32>}]} {
    %c0 = arith.constant 0 : index
    %c0_0 = arith.constant 0 : index
    %0 = vector.load %arg1[%c0, %c0_0] : memref<256x32xf32, #tpu.memory_space<vmem>>, vector<256x32xf32>
    %1 = arith.truncf %0 : vector<256x32xf32> to vector<256x32xbf16>
    %c0_1 = arith.constant 0 : index
    %c0_2 = arith.constant 0 : index
    %2 = vector.load %arg2[%c0_1, %c0_2] : memref<32x32xbf16, #tpu.memory_space<vmem>>, vector<32x32xbf16>
    %cst = arith.constant dense<0.000000e+00> : vector<256x32xf32>
    %3 = tpu.matmul %1, %2, %cst {dimension_numbers = #tpu.dot_dimension_numbers<[1], [0], [0], [1], [0, 0, 1, 1], [], []>} : vector<256x32xbf16>, vector<32x32xbf16>, vector<256x32xf32> -> vector<256x32xf32>
    %c0_3 = arith.constant 0 : index
    %c0_4 = arith.constant 0 : index
    %4 = vector.load %arg3[%c0_3, %c0_4] : memref<1x32xf32, #tpu.memory_space<vmem>>, vector<1x32xf32>
    %5 = vector.broadcast %4 : vector<1x32xf32> to vector<256x32xf32>
    %6 = arith.addf %3, %5 : vector<256x32xf32>
    %7 = arith.truncf %6 : vector<256x32xf32> to vector<256x32xbf16>
    %c0_5 = arith.constant 0 : index
    %c0_6 = arith.constant 0 : index
    %8 = vector.load %arg4[%c0_5, %c0_6] : memref<256x32xbf16, #tpu.memory_space<vmem>>, vector<256x32xbf16>
    tpu.vector_store %arg4[%c0_5, %c0_6], %7 {strides = array<i32>} : memref<256x32xbf16, #tpu.memory_space<vmem>>, vector<256x32xbf16>,
    return
  }
  func.func @transform_0(%arg0: i32) -> (i32, i32) {
    %c0_i32 = arith.constant 0 : i32
    %c0_i32_0 = arith.constant 0 : i32
    return %arg0, %c0_i32 : i32, i32
  }
  func.func @transform_1(%arg0: i32) -> (i32, i32) {
    %c0_i32 = arith.constant 0 : i32
    %c0_i32_0 = arith.constant 0 : i32
    %c0_i32_1 = arith.constant 0 : i32
    return %c0_i32, %c0_i32_0 : i32, i32
  }
  func.func @transform_2(%arg0: i32) -> (i32, i32) {
    %c0_i32 = arith.constant 0 : i32
    %c0_i32_0 = arith.constant 0 : i32
    %c0_i32_1 = arith.constant 0 : i32
    return %c0_i32, %c0_i32_0 : i32, i32
  }
  func.func @transform_3(%arg0: i32) -> (i32, i32) {
    %c0_i32 = arith.constant 0 : i32
    %c0_i32_0 = arith.constant 0 : i32
    return %arg0, %c0_i32 : i32, i32
  }
}

</mosaic_0001>

<bundles_post_ra>
// kernel: linear_forward.1
= control target key start
LH: loop header
LB: loop body
LE: loop exit
PB: predicated region body
PF: predicated region fallthrough
CT: control target
= control target key end

     0   :  { %s863_s12 = smov 0   ;;  %s1043_s0 = inlined_call_operand.vmem [shape: f32[512,32], index: 0, kind: input, shape index: {}]   ;;  %s1044_s1 = inlined_call_operand.vmem [shape: bf16[32,32], index: 1, kind: input, shape index: {}]   ;;  %s1045_s2 = inlined_call_operand.vmem [shape: f32[1,32], index: 2, kind: input, shape index: {}]   ;;  %s1046_s3 = inlined_call_operand.vmem [shape: bf16[512,32], index: 3, kind: output, shape index: {}]  }
   0x1 LB: > { %s673_s13 = sadd.s32 4294967295, %s841_s12   ;;  %p677_p0 = scmp.ge.s32.totalorder %s841_s12, 1  ;;  %s841_s12 = sphi %s863_s12, %s13_s12  }
   0x2   : > { %p138_p1 = scmp.lt.s32.totalorder %s841_s12, 3 }
   0x4   : > { %p139_p2 = pnand %p677_p0, %p138_p1 }
   0x5   : > { %v833_v0 = vld [vmem:[%s1044_s1] sm:$0xff] (!%p139_p2)   ;;  %s678_s16 = sshll.u32 (!%p139_p2), %s673_s13, 5  ;;  %v834_v1 = vld [vmem:[%s1044_s1 + $0x8] sm:$0xff] (!%p139_p2)   ;;  %vm246_vm0 = vcmask (!%p139_p2), 261120   ;;  %vm584_vm1 = vcmask (!%p139_p2), 257024  }
   0x6   : > { %142 = sbr.rel (%p139_p2) target bundleno = 265 (0x109), region = 32  ;;  %p163_p3 = scmp.lt.s32.totalorder (!%p139_p2), %s678_s16, 63  ;;  %785 = vmatprep.subr.bf16.mxu0 (!%p139_p2), %v833_v0  ;;  %821 = vmatprep.subr.bf16.mxu1 (!%p139_p2), %v833_v0  ;;  %v936_v50 = vld [vmem:[%s1045_s2] ss:$0 sm:$0xff] (!%p139_p2) }
   0x7   : > { %786 = vmatpush3.bf16.msra.mxu0 (!%p139_p2), %v833_v0  ;;  %823 = vmatpush3.bf16.msra.mxu1 (!%p139_p2), %v833_v0 }
   0x8   : > { %787 = vmatprep.subr.bf16.mxu0 (!%p139_p2), %v834_v1  ;;  %822 = vmatprep.subr.bf16.mxu1 (!%p139_p2), %v834_v1 }
   0xb   : > { %788 = vmatpush3.bf16.msra.mxu0 (!%p139_p2), %v834_v1  ;;  %824 = vmatpush3.bf16.msra.mxu1 (!%p139_p2), %v834_v1 }
   0xd   : > { %s1048_s16 = smov (!%p163_p3, %s678_s16), 63 }
   0xe   : > { %s679_s19 = sshll.u32 %s1048_s16, 3  ;;  %s681_s25 = sshll.u32 %s1048_s16, 2 }
   0xf   : > { %s883_s22 = scalar_lea.vmem %s1043_s0, %s679_s19  ;;  %s943_s28 = scalar_lea.vmem %s1046_s3, %s681_s25 }
  0x10   : > { %v175_v2 = vld [vmem:[%s883_s22] sm:$0xff]  ;;  %v176_v3 = vld [vmem:[%s883_s22 + $0x8] sm:$0xff]  ;;  %v177_v7 = vld [vmem:[%s883_s22 + $0x10] sm:$0xff] }
  0x11   : > { %v191_v4 = vld [vmem:[%s883_s22 + $0x80] sm:$0xff]  ;;  %v207_v5 = vpack.c.bf16 %v176_v3, %v175_v2  ;;  %v192_v6 = vld [vmem:[%s883_s22 + $0x88] sm:$0xff]  ;;  %v178_v8 = vld [vmem:[%s883_s22 + $0x18] sm:$0xff] }
  0x12   : > { %v215_v9 = vpack.c.bf16 %v192_v6, %v191_v4  ;;  %v208_v10 = vpack.c.bf16 %v178_v8, %v177_v7  ;;  %v193_v11 = vld [vmem:[%s883_s22 + $0x90] sm:$0xff]  ;;  %v194_v12 = vld [vmem:[%s883_s22 + $0x98] sm:$0xff]  ;;  %v179_v13 = vld [vmem:[%s883_s22 + $0x20] sm:$0xff] }
  0x13   : > { %789 = vmatprep.mubr.msk.bf16.mxu0 %vm246_vm0, %v207_v5  ;;  %v216_v14 = vpack.c.bf16 %v194_v12, %v193_v11  ;;  %v180_v15 = vld [vmem:[%s883_s22 + $0x28] sm:$0xff]  ;;  %v195_v16 = vld [vmem:[%s883_s22 + $0xa0] sm:$0xff]  ;;  %v181_v20 = vld [vmem:[%s883_s22 + $0x30] sm:$0xff] }
  0x14   : > { %v196_v17 = vld [vmem:[%s883_s22 + $0xa8] sm:$0xff]  ;;  %805 = vmatprep.mubr.msk.bf16.mxu1 %vm246_vm0, %v215_v9  ;;  %790 = vmatmul.mubr.msk.bf16.vlgmr.msra.gmra.mrb[0].mxu0 %vm246_vm0, %v208_v10  ;;  %v209_v18 = vpack.c.bf16 %v180_v15, %v179_v13  ;;  %v182_v21 = vld [vmem:[%s883_s22 + $0x38] sm:$0xff]  ;;  %v197_v22 = vld [vmem:[%s883_s22 + $0xb0] sm:$0xff] }
  0x15   : > { %v217_v19 = vpack.c.bf16 %v196_v17, %v195_v16  ;;  %806 = vmatmul.mubr.msk.bf16.vlgmr.msra.gmra.mrb[0].mxu1 %vm246_vm0, %v216_v14  ;;  %v198_v23 = vld [vmem:[%s883_s22 + $0xb8] sm:$0xff]  ;;  %v183_v24 = vld [vmem:[%s883_s22 + $0x40] sm:$0xff]  ;;  %v184_v25 = vld [vmem:[%s883_s22 + $0x48] sm:$0xff]  ;;  %v210_v28 = vpack.c.bf16 %v182_v21, %v181_v20 }
  0x16   : > { %793 = vmatprep.mubr.msk.bf16.mxu0 %vm246_vm0, %v209_v18  ;;  %v199_v26 = vld [vmem:[%s883_s22 + $0xc0] sm:$0xff]  ;;  %v200_v27 = vld [vmem:[%s883_s22 + $0xc8] sm:$0xff]  ;;  %v218_v29 = vpack.c.bf16 %v198_v23, %v197_v22  ;;  %v211_v30 = vpack.c.bf16 %v184_v25, %v183_v24  ;;  %v185_v32 = vld [vmem:[%s883_s22 + $0x50] sm:$0xff] }
  0x17   : > { %809 = vmatprep.mubr.msk.bf16.mxu1 %vm246_vm0, %v217_v19  ;;  %v219_v31 = vpack.c.bf16 %v200_v27, %v199_v26  ;;  %v186_v33 = vld [vmem:[%s883_s22 + $0x58] sm:$0xff]  ;;  %v201_v34 = vld [vmem:[%s883_s22 + $0xd0] sm:$0xff]  ;;  %v187_v36 = vld [vmem:[%s883_s22 + $0x60] sm:$0xff] }
  0x18   : > { %v202_v35 = vld [vmem:[%s883_s22 + $0xd8] sm:$0xff]  ;;  %v188_v37 = vld [vmem:[%s883_s22 + $0x68] sm:$0xff]  ;;  %v203_v38 = vld [vmem:[%s883_s22 + $0xe0] sm:$0xff]  ;;  %v212_v40 = vpack.c.bf16 %v186_v33, %v185_v32 }
  0x19   : > { %v204_v39 = vld [vmem:[%s883_s22 + $0xe8] sm:$0xff]  ;;  %v220_v41 = vpack.c.bf16 %v202_v35, %v201_v34  ;;  %v213_v42 = vpack.c.bf16 %v188_v37, %v187_v36  ;;  %v189_v44 = vld [vmem:[%s883_s22 + $0x70] sm:$0xff]  ;;  %v190_v45 = vld [vmem:[%s883_s22 + $0x78] sm:$0xff] }
  0x1a   : > { %v221_v43 = vpack.c.bf16 %v204_v39, %v203_v38  ;;  %v205_v46 = vld [vmem:[%s883_s22 + $0xf0] sm:$0xff]  ;;  %v206_v47 = vld [vmem:[%s883_s22 + $0xf8] sm:$0xff]  ;;  %v214_v48 = vpack.c.bf16 %v190_v45, %v189_v44 }
  0x1b   : > { %v222_v49 = vpack.c.bf16 %v206_v47, %v205_v46 }
  0x1c   : > { %794 = vmatmul.mubr.msk.bf16.gmra.mrb[4].mxu0 %vm246_vm0, %v210_v28 }
  0x1d   : > { %810 = vmatmul.mubr.msk.bf16.gmra.mrb[4].mxu1 %vm246_vm0, %v218_v29  ;;  %797 = vmatprep.mubr.msk.bf16.mxu0 %vm246_vm0, %v211_v30 }
  0x1e   : > { %813 = vmatprep.mubr.msk.bf16.mxu1 %vm246_vm0, %v219_v31 }
  0x24   : > { %798 = vmatmul.mubr.msk.bf16.gmra.mrb[8].mxu0 %vm246_vm0, %v212_v40 }
  0x25   : > { %814 = vmatmul.mubr.msk.bf16.gmra.mrb[8].mxu1 %vm246_vm0, %v220_v41  ;;  %801 = vmatprep.mubr.msk.bf16.mxu0 %vm246_vm0, %v213_v42 }
  0x26   : > { %817 = vmatprep.mubr.msk.bf16.mxu1 %vm246_vm0, %v221_v43 }
  0x2c   : > { %802 = vmatmul.mubr.msk.bf16.gmra.mrb[12].mxu0 %vm246_vm0, %v214_v48 }
  0x2d   : > { %818 = vmatmul.mubr.msk.bf16.gmra.mrb[12].mxu1 %vm246_vm0, %v222_v49 }
  0xe7   : > { %v791_v51 = vpop.f32.mrb[0].mxu0 }
  0xe8   : > { %v338_v52 = vadd.f32 %v791_v51, %v936_v50  ;;  %v807_v53 = vpop.f32.mrb[0].mxu1  ;;  %v329_v54 = vpop.f32.mrb[1].mxu0 }
  0xe9   : > { %v402_v55 = vadd.f32 %v807_v53, %v936_v50  ;;  %v330_v56 = vadd.f32 %v936_v50, %v329_v54  ;;  %v393_v57 = vpop.f32.mrb[1].mxu1  ;;  %v792_v58 = vpop.f32.mrb[2].mxu0 }
  0xea   : > { %v737_v59 = vpack.c.bf16 %v338_v52, %v338_v52  ;;  %v394_v60 = vadd.f32 %v936_v50, %v393_v57  ;;  %v341_v61 = vadd.f32 %v792_v58, %v936_v50  ;;  %v808_v62 = vpop.f32.mrb[2].mxu1  ;;  %v332_v63 = vpop.f32.mrb[3].mxu0 }
  0xeb   : > { %v753_v0 = vpack.c.bf16 %v402_v55, %v402_v55  ;;  %v735_v1 = vpack.c.bf16 %v330_v56, %v330_v56  ;;  %v405_v2 = vadd.f32 %v808_v62, %v936_v50  ;;  %v333_v3 = vadd.f32 %v936_v50, %v332_v63  ;;  %v396_v4 = vpop.f32.mrb[3].mxu1 }
  0xec   : > { %587 = vst.msk [vmem:[%s943_s28 + $0x8] sm:$0xf] %vm584_vm1, %v737_v59  ;;  %v751_v5 = vpack.c.bf16 %v394_v60, %v394_v60  ;;  %v738_v6 = vpack.c.bf16 %v341_v61, %v341_v61  ;;  %v397_v7 = vadd.f32 %v936_v50, %v396_v4 }
  0xed   : > { %603 = vst.msk [vmem:[%s943_s28 + $0x48] sm:$0xf] %vm584_vm1, %v753_v0  ;;  %585 = vst.msk [vmem:[%s943_s28] sm:$0xf] %vm584_vm1, %v735_v1  ;;  %v754_v8 = vpack.c.bf16 %v405_v2, %v405_v2  ;;  %v736_v9 = vpack.c.bf16 %v333_v3, %v333_v3 }
  0xee   : > { %601 = vst.msk [vmem:[%s943_s28 + $0x40] sm:$0xf] %vm584_vm1, %v751_v5  ;;  %588 = vst.msk [vmem:[%s943_s28 + $0xc] sm:$0xf] %vm584_vm1, %v738_v6  ;;  %v752_v10 = vpack.c.bf16 %v397_v7, %v397_v7 }
  0xef   : > { %604 = vst.msk [vmem:[%s943_s28 + $0x4c] sm:$0xf] %vm584_vm1, %v754_v8  ;;  %586 = vst.msk [vmem:[%s943_s28 + $0x4] sm:$0xf] %vm584_vm1, %v736_v9  ;;  %v795_v11 = vpop.f32.mrb[4].mxu0 }
  0xf0   : > { %602 = vst.msk [vmem:[%s943_s28 + $0x44] sm:$0xf] %vm584_vm1, %v752_v10  ;;  %v354_v12 = vadd.f32 %v795_v11, %v936_v50  ;;  %v811_v13 = vpop.f32.mrb[4].mxu1  ;;  %v345_v14 = vpop.f32.mrb[5].mxu0 }
  0xf1   : > { %v418_v15 = vadd.f32 %v811_v13, %v936_v50  ;;  %v346_v16 = vadd.f32 %v936_v50, %v345_v14  ;;  %v409_v17 = vpop.f32.mrb[5].mxu1  ;;  %v796_v18 = vpop.f32.mrb[6].mxu0 }
  0xf2   : > { %v741_v19 = vpack.c.bf16 %v354_v12, %v354_v12  ;;  %v410_v20 = vadd.f32 %v936_v50, %v409_v17  ;;  %v357_v21 = vadd.f32 %v796_v18, %v936_v50  ;;  %v812_v22 = vpop.f32.mrb[6].mxu1  ;;  %v348_v23 = vpop.f32.mrb[7].mxu0 }
  0xf3   : > { %v757_v24 = vpack.c.bf16 %v418_v15, %v418_v15  ;;  %v739_v25 = vpack.c.bf16 %v346_v16, %v346_v16  ;;  %v421_v26 = vadd.f32 %v812_v22, %v936_v50  ;;  %v349_v27 = vadd.f32 %v936_v50, %v348_v23  ;;  %v412_v28 = vpop.f32.mrb[7].mxu1 }
  0xf4   : > { %591 = vst.msk [vmem:[%s943_s28 + $0x18] sm:$0xf] %vm584_vm1, %v741_v19  ;;  %v755_v29 = vpack.c.bf16 %v410_v20, %v410_v20  ;;  %v742_v30 = vpack.c.bf16 %v357_v21, %v357_v21  ;;  %v413_v31 = vadd.f32 %v936_v50, %v412_v28 }
  0xf5   : > { %607 = vst.msk [vmem:[%s943_s28 + $0x58] sm:$0xf] %vm584_vm1, %v757_v24  ;;  %589 = vst.msk [vmem:[%s943_s28 + $0x10] sm:$0xf] %vm584_vm1, %v739_v25  ;;  %v758_v32 = vpack.c.bf16 %v421_v26, %v421_v26  ;;  %v740_v33 = vpack.c.bf16 %v349_v27, %v349_v27 }
  0xf6   : > { %605 = vst.msk [vmem:[%s943_s28 + $0x50] sm:$0xf] %vm584_vm1, %v755_v29  ;;  %592 = vst.msk [vmem:[%s943_s28 + $0x1c] sm:$0xf] %vm584_vm1, %v742_v30  ;;  %v756_v34 = vpack.c.bf16 %v413_v31, %v413_v31 }
  0xf7   : > { %608 = vst.msk [vmem:[%s943_s28 + $0x5c] sm:$0xf] %vm584_vm1, %v758_v32  ;;  %590 = vst.msk [vmem:[%s943_s28 + $0x14] sm:$0xf] %vm584_vm1, %v740_v33  ;;  %v799_v35 = vpop.f32.mrb[8].mxu0 }
  0xf8   : > { %606 = vst.msk [vmem:[%s943_s28 + $0x54] sm:$0xf] %vm584_vm1, %v756_v34  ;;  %v370_v36 = vadd.f32 %v799_v35, %v936_v50  ;;  %v815_v37 = vpop.f32.mrb[8].mxu1  ;;  %v361_v38 = vpop.f32.mrb[9].mxu0 }
  0xf9   : > { %v434_v39 = vadd.f32 %v815_v37, %v936_v50  ;;  %v362_v40 = vadd.f32 %v936_v50, %v361_v38  ;;  %v425_v41 = vpop.f32.mrb[9].mxu1  ;;  %v800_v42 = vpop.f32.mrb[10].mxu0 }
  0xfa   : > { %v745_v43 = vpack.c.bf16 %v370_v36, %v370_v36  ;;  %v426_v44 = vadd.f32 %v936_v50, %v425_v41  ;;  %v373_v45 = vadd.f32 %v800_v42, %v936_v50  ;;  %v816_v46 = vpop.f32.mrb[10].mxu1  ;;  %v364_v47 = vpop.f32.mrb[11].mxu0 }
  0xfb   : > { %v761_v48 = vpack.c.bf16 %v434_v39, %v434_v39  ;;  %v743_v49 = vpack.c.bf16 %v362_v40, %v362_v40  ;;  %v437_v51 = vadd.f32 %v816_v46, %v936_v50  ;;  %v365_v52 = vadd.f32 %v936_v50, %v364_v47  ;;  %v428_v53 = vpop.f32.mrb[11].mxu1 }
  0xfc   : > { %595 = vst.msk [vmem:[%s943_s28 + $0x28] sm:$0xf] %vm584_vm1, %v745_v43  ;;  %v759_v54 = vpack.c.bf16 %v426_v44, %v426_v44  ;;  %v746_v55 = vpack.c.bf16 %v373_v45, %v373_v45  ;;  %v429_v56 = vadd.f32 %v936_v50, %v428_v53 }
  0xfd   : > { %611 = vst.msk [vmem:[%s943_s28 + $0x68] sm:$0xf] %vm584_vm1, %v761_v48  ;;  %593 = vst.msk [vmem:[%s943_s28 + $0x20] sm:$0xf] %vm584_vm1, %v743_v49  ;;  %v762_v57 = vpack.c.bf16 %v437_v51, %v437_v51  ;;  %v744_v58 = vpack.c.bf16 %v365_v52, %v365_v52 }
  0xfe   : > { %609 = vst.msk [vmem:[%s943_s28 + $0x60] sm:$0xf] %vm584_vm1, %v759_v54  ;;  %596 = vst.msk [vmem:[%s943_s28 + $0x2c] sm:$0xf] %vm584_vm1, %v746_v55  ;;  %v760_v59 = vpack.c.bf16 %v429_v56, %v429_v56 }
  0xff   : > { %612 = vst.msk [vmem:[%s943_s28 + $0x6c] sm:$0xf] %vm584_vm1, %v762_v57  ;;  %594 = vst.msk [vmem:[%s943_s28 + $0x24] sm:$0xf] %vm584_vm1, %v744_v58  ;;  %v803_v60 = vpop.f32.mrb[12].mxu0 }
 0x100   : > { %610 = vst.msk [vmem:[%s943_s28 + $0x64] sm:$0xf] %vm584_vm1, %v760_v59  ;;  %v386_v61 = vadd.f32 %v803_v60, %v936_v50  ;;  %v819_v62 = vpop.f32.mrb[12].mxu1  ;;  %v377_v63 = vpop.f32.mrb[13].mxu0 }
 0x101   : > { %v450_v0 = vadd.f32 %v819_v62, %v936_v50  ;;  %v378_v1 = vadd.f32 %v936_v50, %v377_v63  ;;  %v441_v2 = vpop.f32.mrb[13].mxu1  ;;  %v804_v3 = vpop.f32.mrb[14].mxu0 }
 0x102   : > { %v749_v4 = vpack.c.bf16 %v386_v61, %v386_v61  ;;  %v442_v5 = vadd.f32 %v936_v50, %v441_v2  ;;  %v389_v6 = vadd.f32 %v804_v3, %v936_v50  ;;  %v820_v7 = vpop.f32.mrb[14].mxu1  ;;  %v380_v8 = vpop.f32.mrb[15].mxu0 }
 0x103   : > { %v765_v9 = vpack.c.bf16 %v450_v0, %v450_v0  ;;  %v747_v10 = vpack.c.bf16 %v378_v1, %v378_v1  ;;  %v453_v11 = vadd.f32 %v820_v7, %v936_v50  ;;  %v381_v12 = vadd.f32 %v936_v50, %v380_v8  ;;  %v444_v13 = vpop.f32.mrb[15].mxu1 }
 0x104   : > { %599 = vst.msk [vmem:[%s943_s28 + $0x38] sm:$0xf] %vm584_vm1, %v749_v4  ;;  %v763_v14 = vpack.c.bf16 %v442_v5, %v442_v5  ;;  %v750_v15 = vpack.c.bf16 %v389_v6, %v389_v6  ;;  %v445_v16 = vadd.f32 %v936_v50, %v444_v13 }
 0x105   : > { %615 = vst.msk [vmem:[%s943_s28 + $0x78] sm:$0xf] %vm584_vm1, %v765_v9  ;;  %597 = vst.msk [vmem:[%s943_s28 + $0x30] sm:$0xf] %vm584_vm1, %v747_v10  ;;  %v766_v17 = vpack.c.bf16 %v453_v11, %v453_v11  ;;  %v748_v18 = vpack.c.bf16 %v381_v12, %v381_v12 }
 0x106   : > { %613 = vst.msk [vmem:[%s943_s28 + $0x70] sm:$0xf] %vm584_vm1, %v763_v14  ;;  %600 = vst.msk [vmem:[%s943_s28 + $0x3c] sm:$0xf] %vm584_vm1, %v750_v15  ;;  %v764_v19 = vpack.c.bf16 %v445_v16, %v445_v16 }
 0x107   : > { %616 = vst.msk [vmem:[%s943_s28 + $0x7c] sm:$0xf] %vm584_vm1, %v766_v17  ;;  %598 = vst.msk [vmem:[%s943_s28 + $0x34] sm:$0xf] %vm584_vm1, %v748_v18 }
 0x108   : > { %614 = vst.msk [vmem:[%s943_s28 + $0x74] sm:$0xf] %vm584_vm1, %v764_v19 }
 0x109 PF: > { %s13_s12 = sadd.s32 1, %s841_s12  }
 0x10a   : > { %p10_p4 = scmp.ge.s32.totalorder %s13_s12, 4  }
 0x10c   :  { %12 = sbr.rel (!%p10_p4) target bundleno = 1 (0x1), region = 62 }

</bundles_post_ra>
